<compile_context>
chip_gen: v6e
topology: v6e:2x2x1
jax: 0.10.0
libtpu: 0.0.40
codegen_flags: <defaults>
</compile_context>

<pallas_src>
import functools
import math

import jax
import jax.numpy as jnp
from jax.experimental import pallas as pl
from jax.experimental.pallas import tpu as pltpu

_LANES = 128
_TILE_ROWS = 2048   # (2048, 128) f32 tile = 1 MiB per stream buffer


# ---------------------------------------------------------------------------
# Kernels
# ---------------------------------------------------------------------------
def _mse_sum_kernel(br, rows, bpc, num_blocks, p_ref, t_ref, part_ref, acc_ref):
    """Unweighted path: accumulate sum((p - t)^2); flush a per-chunk partial."""
    c = pl.program_id(0)
    r = pl.program_id(1)
    g = c * bpc + r                       # global row-block index

    @pl.when(r == 0)
    def _():
        acc_ref[...] = jnp.zeros_like(acc_ref)

    d = p_ref[...].astype(jnp.float32) - t_ref[...].astype(jnp.float32)
    sq = d * d

    if rows % br:                         # only the final global block is ragged
        @pl.when(g == num_blocks - 1)
        def _():
            row = jax.lax.broadcasted_iota(jnp.int32, sq.shape, 0) + g * br
            acc_ref[...] += jnp.where(row < rows, sq, 0.0)

        @pl.when(g != num_blocks - 1)
        def _():
            acc_ref[...] += sq
    else:
        acc_ref[...] += sq

    @pl.when(r == bpc - 1)
    def _():
        part_ref[...] = jnp.broadcast_to(jnp.sum(acc_ref[...]), part_ref.shape)


def _wmse_kernel(br, rows, bpc, num_blocks, p_ref, t_ref, w_ref,
                 prios_ref, part_ref, acc_ref):
    """Weighted path.  w block is (br,1) for grouped/per-row weights or
    (br,128) for the dense elementwise fallback; broadcast handles both."""
    c = pl.program_id(0)
    r = pl.program_id(1)
    g = c * bpc + r

    @pl.when(r == 0)
    def _():
        acc_ref[...] = jnp.zeros_like(acc_ref)

    d = p_ref[...].astype(jnp.float32) - t_ref[...].astype(jnp.float32)
    losses = w_ref[...].astype(jnp.float32) * d * d
    prios_ref[...] = (losses + 1e-5).astype(prios_ref.dtype)   # ragged OOB rows dropped

    if rows % br:
        @pl.when(g == num_blocks - 1)
        def _():
            row = jax.lax.broadcasted_iota(jnp.int32, losses.shape, 0) + g * br
            acc_ref[...] += jnp.where(row < rows, losses, 0.0)

        @pl.when(g != num_blocks - 1)
        def _():
            acc_ref[...] += losses
    else:
        acc_ref[...] += losses

    @pl.when(r == bpc - 1)
    def _():
        part_ref[...] = jnp.broadcast_to(jnp.sum(acc_ref[...]), part_ref.shape)


# ---------------------------------------------------------------------------
# pallas_call wrappers
# ---------------------------------------------------------------------------
def _grid_geometry(rows):
    br = min(_TILE_ROWS, rows)            # br == rows or multiple of 8
    num_blocks = pl.cdiv(rows, br)
    nc = 2 if (num_blocks % 2 == 0 and num_blocks >= 2) else 1
    bpc = num_blocks // nc
    return br, num_blocks, nc, bpc


def _flat_2d(x, padded_len):
    x = x.reshape(-1)
    n = x.shape[0]
    if padded_len != n:
        # TODO(synk): rare unaligned tail (numel % 128 != 0) still pays a pad
        # copy; an in-kernel lane mask on the last row would avoid it.
        x = jnp.pad(x, (0, padded_len - n))
    return x.reshape(padded_len // _LANES, _LANES)


def _mse_sum(pred, true):
    n = pred.size
    padded_n = pl.cdiv(n, _LANES) * _LANES
    rows = padded_n // _LANES
    br, num_blocks, nc, bpc = _grid_geometry(rows)

    data_blk = pl.BlockSpec((br, _LANES), lambda c, r: (c * bpc + r, 0))
    part_blk = pl.BlockSpec((1, 8, _LANES), lambda c, r: (c, 0, 0))

    partials = pl.pallas_call(
        functools.partial(_mse_sum_kernel, br, rows, bpc, num_blocks),
        out_shape=jax.ShapeDtypeStruct((nc, 8, _LANES), jnp.float32),
        grid_spec=pltpu.PrefetchScalarGridSpec(
            num_scalar_prefetch=0,
            grid=(nc, bpc),
            in_specs=[data_blk, data_blk],
            out_specs=part_blk,
            scratch_shapes=[pltpu.VMEM((br, _LANES), jnp.float32)],
        ),
        compiler_params=pltpu.CompilerParams(
            dimension_semantics=("parallel", "arbitrary")),
        cost_estimate=pl.CostEstimate(
            flops=3 * n, transcendentals=0,
            bytes_accessed=2 * n * pred.dtype.itemsize + nc * 8 * _LANES * 4),
    )(_flat_2d(pred, padded_n), _flat_2d(true, padded_n))
    return jnp.sum(partials[:, 0, 0])


def _wmse_call(pred2d, true2d, w_arr, prios_dtype, n_true):
    rows = pred2d.shape[0]
    br, num_blocks, nc, bpc = _grid_geometry(rows)

    data_blk = pl.BlockSpec((br, _LANES), lambda c, r: (c * bpc + r, 0))
    w_blk = pl.BlockSpec((br, w_arr.shape[1]), lambda c, r: (c * bpc + r, 0))
    part_blk = pl.BlockSpec((1, 8, _LANES), lambda c, r: (c, 0, 0))

    prios2d, partials = pl.pallas_call(
        functools.partial(_wmse_kernel, br, rows, bpc, num_blocks),
        out_shape=(jax.ShapeDtypeStruct((rows, _LANES), prios_dtype),
                   jax.ShapeDtypeStruct((nc, 8, _LANES), jnp.float32)),
        grid_spec=pltpu.PrefetchScalarGridSpec(
            num_scalar_prefetch=0,
            grid=(nc, bpc),
            in_specs=[data_blk, data_blk, w_blk],
            out_specs=(data_blk, part_blk),
            scratch_shapes=[pltpu.VMEM((br, _LANES), jnp.float32)],
        ),
        compiler_params=pltpu.CompilerParams(
            dimension_semantics=("parallel", "arbitrary")),
        cost_estimate=pl.CostEstimate(
            flops=4 * n_true, transcendentals=0,
            bytes_accessed=(2 * n_true * pred2d.dtype.itemsize
                            + w_arr.size * w_arr.dtype.itemsize
                            + n_true * jnp.dtype(prios_dtype).itemsize
                            + nc * 8 * _LANES * 4)),
    )(pred2d, true2d, w_arr)
    return prios2d, jnp.sum(partials[:, 0, 0])


# ---------------------------------------------------------------------------
# Public forward
# ---------------------------------------------------------------------------
def _weighted_mse_impl(pred, true, weights=None):
    """Returns (loss, sample_prios).  sample_prios is None when weights is
    None (the torch module only updates it on the weighted path)."""
    n = pred.size
    shape = pred.shape

    if weights is None:
        return _mse_sum(pred, true) / jnp.float32(n), None

    w = jnp.asarray(weights)
    # Torch promotion of `weights * (pred - true)**2` -> prios stored in the
    # promoted dtype (bf16 inputs give a bf16 prios stream; f32 here).
    prios_dtype = jnp.result_type(pred.dtype, true.dtype, w.dtype)

    # Which pred axes does the weight actually vary on?
    wshape = (1,) * (pred.ndim - w.ndim) + tuple(w.shape)
    vary = [d for d in range(pred.ndim) if wshape[d] != 1]

    if not vary:                           # scalar weight
        g_count, group_elems = 1, n
    else:
        last = vary[-1]
        g_count = int(math.prod(shape[:last + 1]))
        group_elems = n // g_count

    aligned = (n % _LANES == 0)
    padded_n = pl.cdiv(n, _LANES) * _LANES
    rows = padded_n // _LANES

    if (not vary) or group_elems % _LANES == 0:
        # ---- grouped path: weight constant over aligned 128-elem rows ----
        if not vary:
            w_g = jnp.reshape(w, (1,)).astype(jnp.float32)
        else:
            w_g = jnp.broadcast_to(jnp.reshape(w, wshape[:last + 1]),
                                   shape[:last + 1]).reshape(-1).astype(jnp.float32)
        rows_per_group = rows // g_count
        w_rows = jnp.broadcast_to(w_g[:, None],
                                  (g_count, rows_per_group)).reshape(rows, 1)
        prios2d, total = _wmse_call(_flat_2d(pred, padded_n),
                                    _flat_2d(true, padded_n),
                                    w_rows, prios_dtype, n)
    else:
        # ---- dense fallback: weight varies inside a 128-lane row ---------
        w_full = jnp.broadcast_to(jnp.reshape(w, wshape), shape)   # native dtype
        prios2d, total = _wmse_call(_flat_2d(pred, padded_n),
                                    _flat_2d(true, padded_n),
                                    _flat_2d(w_full, padded_n),
                                    prios_dtype, n)

    loss = total / jnp.float32(n)
    if aligned:
        prios = prios2d.reshape(shape)            # free reshape, no slice copy
    else:
        prios = prios2d.reshape(-1)[:n].reshape(shape)
    return loss, prios


weighted_mse = jax.jit(_weighted_mse_impl)


# ---------------------------------------------------------------------------
# Demo / self-check
# ---------------------------------------------------------------------------
if __name__ == "__main__":
    key = jax.random.PRNGKey(0)
    k1, k2, k3, k4, k5 = jax.random.split(key, 5)

    B, C, H, W = 2, 4, 16, 16
    pred = jax.random.normal(k1, (B, C, H, W), jnp.float32)
    true = jax.random.normal(k2, (B, C, H, W), jnp.float32)

    w_ps = jax.random.uniform(k3, (B, 1, 1, 1), jnp.float32) + 0.5   # grouped (per-sample)
    w_ch = jax.random.uniform(k4, (1, C, 1, 1), jnp.float32) + 0.5   # grouped (per-channel)
    w_el = jax.random.uniform(k5, (1, 1, 1, W), jnp.float32) + 0.5   # dense fallback

    loss_ps, prios_ps = weighted_mse(pred, true, w_ps)
    loss_ch, prios_ch = weighted_mse(pred, true, w_ch)
    loss_el, prios_el = weighted_mse(pred, true, w_el)
    loss_u, prios_u = weighted_mse(pred, true, None)
    jax.block_until_ready((loss_ps, prios_ps, loss_ch, prios_ch,
                           loss_el, prios_el, loss_u))

    def ref(p, t, w=None):
        if w is None:
            return jnp.mean((p - t) ** 2), None
        losses = jnp.broadcast_to(jnp.asarray(w, jnp.float32), p.shape) * (p - t) ** 2
        return jnp.mean(losses), losses + 1e-5

    for (lss, pr), ww in [((loss_ps, prios_ps), w_ps),
                          ((loss_ch, prios_ch), w_ch),
                          ((loss_el, prios_el), w_el)]:
        rl, rp = ref(pred, true, ww)
        assert jnp.allclose(lss, rl, rtol=1e-5, atol=1e-6)
        assert pr.shape == pred.shape
        assert jnp.allclose(pr, rp, rtol=1e-5, atol=1e-6)

    rl_u, _ = ref(pred, true)
    assert jnp.allclose(loss_u, rl_u, rtol=1e-5, atol=1e-6)
    assert prios_u is None

    print("KERNEL_OK")
</pallas_src>

<mosaic_0001>
module attributes {stable_mosaic.version = 11 : i64} {
  func.func @_wmse_kernel(%arg0: i32, %arg1: i32, %arg2: memref<16x128xf32, #tpu.memory_space<vmem>>, %arg3: memref<16x128xf32, #tpu.memory_space<vmem>>, %arg4: memref<16x1xf32, #tpu.memory_space<vmem>>, %arg5: memref<16x128xf32, #tpu.memory_space<vmem>>, %arg6: memref<1x8x128xf32, #tpu.memory_space<vmem>>, %arg7: memref<16x128xf32, #tpu.memory_space<vmem>>) attributes {dimension_semantics = [#tpu.dimension_semantics<parallel>, #tpu.dimension_semantics<arbitrary>], iteration_bounds = array<i64: 1, 1>, scalar_prefetch = 0 : i64, scratch_operands = 1 : i64, tpu.core_type = #tpu.core_type<tc>, window_params = [{transform_indices = @transform_0, window_bounds = array<i64: 16, 128>}, {transform_indices = @transform_1, window_bounds = array<i64: 16, 128>}, {transform_indices = @transform_2, window_bounds = array<i64: 16, 1>}, {transform_indices = @transform_3, window_bounds = array<i64: 16, 128>}, {transform_indices = @transform_4, window_bounds = array<i64: 1, 8, 128>}]} {
    %c0_i32 = arith.constant 0 : i32
    %0 = arith.cmpi eq, %arg1, %c0_i32 : i32
    %1 = arith.extui %0 : i1 to i32
    %c0_i32_0 = arith.constant 0 : i32
    %2 = arith.cmpi ne, %1, %c0_i32_0 : i32
    scf.if %2 {
      %cst_14 = arith.constant 0.000000e+00 : f32
      %19 = vector.broadcast %cst_14 : f32 to vector<16x128xf32>
      %c0_15 = arith.constant 0 : index
      %c0_16 = arith.constant 0 : index
      %20 = vector.load %arg7[%c0_15, %c0_16] : memref<16x128xf32, #tpu.memory_space<vmem>>, vector<16x128xf32>
      tpu.vector_store %arg7[%c0_15, %c0_16], %19 {strides = array<i32>} : memref<16x128xf32, #tpu.memory_space<vmem>>, vector<16x128xf32>,
    } else {
    }
    %c0 = arith.constant 0 : index
    %c0_1 = arith.constant 0 : index
    %3 = vector.load %arg2[%c0, %c0_1] : memref<16x128xf32, #tpu.memory_space<vmem>>, vector<16x128xf32>
    %c0_2 = arith.constant 0 : index
    %c0_3 = arith.constant 0 : index
    %4 = vector.load %arg3[%c0_2, %c0_3] : memref<16x128xf32, #tpu.memory_space<vmem>>, vector<16x128xf32>
    %5 = arith.subf %3, %4 : vector<16x128xf32>
    %c0_4 = arith.constant 0 : index
    %c0_5 = arith.constant 0 : index
    %6 = vector.load %arg4[%c0_4, %c0_5] : memref<16x1xf32, #tpu.memory_space<vmem>>, vector<16x1xf32>
    %7 = vector.broadcast %6 : vector<16x1xf32> to vector<16x128xf32>
    %8 = arith.mulf %7, %5 : vector<16x128xf32>
    %9 = arith.mulf %8, %5 : vector<16x128xf32>
    %cst = arith.constant 9.99999974E-6 : f32
    %10 = vector.broadcast %cst : f32 to vector<16x128xf32>
    %11 = arith.addf %9, %10 : vector<16x128xf32>
    %c0_6 = arith.constant 0 : index
    %c0_7 = arith.constant 0 : index
    %12 = vector.load %arg5[%c0_6, %c0_7] : memref<16x128xf32, #tpu.memory_space<vmem>>, vector<16x128xf32>
    tpu.vector_store %arg5[%c0_6, %c0_7], %11 {strides = array<i32>} : memref<16x128xf32, #tpu.memory_space<vmem>>, vector<16x128xf32>,
    %c0_8 = arith.constant 0 : index
    %c0_9 = arith.constant 0 : index
    %13 = vector.load %arg7[%c0_8, %c0_9] : memref<16x128xf32, #tpu.memory_space<vmem>>, vector<16x128xf32>
    %14 = arith.addf %13, %9 : vector<16x128xf32>
    %c0_10 = arith.constant 0 : index
    %c0_11 = arith.constant 0 : index
    %15 = vector.load %arg7[%c0_10, %c0_11] : memref<16x128xf32, #tpu.memory_space<vmem>>, vector<16x128xf32>
    tpu.vector_store %arg7[%c0_10, %c0_11], %14 {strides = array<i32>} : memref<16x128xf32, #tpu.memory_space<vmem>>, vector<16x128xf32>,
    %c0_i32_12 = arith.constant 0 : i32
    %16 = arith.cmpi eq, %arg1, %c0_i32_12 : i32
    %17 = arith.extui %16 : i1 to i32
    %c0_i32_13 = arith.constant 0 : i32
    %18 = arith.cmpi ne, %17, %c0_i32_13 : i32
    scf.if %18 {
      %c0_14 = arith.constant 0 : index
      %c0_15 = arith.constant 0 : index
      %19 = vector.load %arg7[%c0_14, %c0_15] : memref<16x128xf32, #tpu.memory_space<vmem>>, vector<16x128xf32>
      %20 = vector.shape_cast %19 : vector<16x128xf32> to vector<1x16x128xf32>
      %cst_16 = arith.constant dense<0.000000e+00> : vector<1xf32>
      %21 = vector.multi_reduction <add>, %20, %cst_16 [1, 2] : vector<1x16x128xf32> to vector<1xf32>
      %22 = vector.shape_cast %21 : vector<1xf32> to vector<1x1x1xf32>
      %23 = vector.extract %22[0, 0, 0] : f32 from vector<1x1x1xf32>
      %24 = vector.broadcast %23 : f32 to vector<1x8x128xf32>
      %c0_17 = arith.constant 0 : index
      %c0_18 = arith.constant 0 : index
      %c0_19 = arith.constant 0 : index
      %25 = vector.load %arg6[%c0_17, %c0_18, %c0_19] : memref<1x8x128xf32, #tpu.memory_space<vmem>>, vector<1x8x128xf32>
      tpu.vector_store %arg6[%c0_17, %c0_18, %c0_19], %24 {strides = array<i32>} : memref<1x8x128xf32, #tpu.memory_space<vmem>>, vector<1x8x128xf32>,
    } else {
    }
    return
  }
  func.func @transform_0(%arg0: i32, %arg1: i32) -> (i32, i32) {
    %c1_i32 = arith.constant 1 : i32
    %0 = arith.muli %arg0, %c1_i32 : i32
    %1 = arith.addi %0, %arg1 : i32
    %c0_i32 = arith.constant 0 : i32
    %c0_i32_0 = arith.constant 0 : i32
    return %1, %c0_i32 : i32, i32
  }
  func.func @transform_1(%arg0: i32, %arg1: i32) -> (i32, i32) {
    %c1_i32 = arith.constant 1 : i32
    %0 = arith.muli %arg0, %c1_i32 : i32
    %1 = arith.addi %0, %arg1 : i32
    %c0_i32 = arith.constant 0 : i32
    %c0_i32_0 = arith.constant 0 : i32
    return %1, %c0_i32 : i32, i32
  }
  func.func @transform_2(%arg0: i32, %arg1: i32) -> (i32, i32) {
    %c1_i32 = arith.constant 1 : i32
    %0 = arith.muli %arg0, %c1_i32 : i32
    %1 = arith.addi %0, %arg1 : i32
    %c0_i32 = arith.constant 0 : i32
    %c0_i32_0 = arith.constant 0 : i32
    return %1, %c0_i32 : i32, i32
  }
  func.func @transform_3(%arg0: i32, %arg1: i32) -> (i32, i32) {
    %c1_i32 = arith.constant 1 : i32
    %0 = arith.muli %arg0, %c1_i32 : i32
    %1 = arith.addi %0, %arg1 : i32
    %c0_i32 = arith.constant 0 : i32
    %c0_i32_0 = arith.constant 0 : i32
    return %1, %c0_i32 : i32, i32
  }
  func.func @transform_4(%arg0: i32, %arg1: i32) -> (i32, i32, i32) {
    %c0_i32 = arith.constant 0 : i32
    %c0_i32_0 = arith.constant 0 : i32
    %c0_i32_1 = arith.constant 0 : i32
    return %arg0, %c0_i32, %c0_i32_0 : i32, i32, i32
  }
}

</mosaic_0001>

<bundles_post_ra>
// kernel: _weighted_mse_impl.1
= control target key start
LH: loop header
LB: loop body
LE: loop exit
PB: predicated region body
PF: predicated region fallthrough
CT: control target
= control target key end

     0   :  { %v203_v0 = vmov 0   ;;  %s256_s2 = inlined_call_operand.vmem [shape: f32[16,1], index: 2, kind: input, shape index: {}]   ;;  %s257_s0 = inlined_call_operand.vmem [shape: f32[16,128], index: 0, kind: input, shape index: {}]   ;;  %s258_s1 = inlined_call_operand.vmem [shape: f32[16,128], index: 1, kind: input, shape index: {}]   ;;  %s259_s3 = inlined_call_operand.vmem [shape: f32[16,128], index: 3, kind: output, shape index: {0}]   ;;  %s260_s4 = inlined_call_operand.vmem [shape: f32[1,8,128], index: 4, kind: output, shape index: {1}]  }
   0x1   :  { %202 = vset.pattern.permute.xlu0 %v203_v0  ;;  %v108_v1 = vld [vmem:[%s256_s2] sm:$0xff]  ;;  %v109_v2 = vld [vmem:[%s256_s2 + $0x8] sm:$0xff] }
   0x2   :  { %112 = vperm.xlu0 %202, %v108_v1   ;;  %v102_v3 = vld [vmem:[%s257_s0] sm:$0xff]  ;;  %v103_v6 = vld [vmem:[%s257_s0 + $0x8] sm:$0xff] }
   0x3   :  { %v104_v4 = vld [vmem:[%s258_s1] sm:$0xff]  ;;  %v105_v7 = vld [vmem:[%s258_s1 + $0x8] sm:$0xff] }
   0x4   :  { %v106_v5 = vsub.f32 %v102_v3, %v104_v4  ;;  %v107_v10 = vsub.f32 %v103_v6, %v105_v7 }
   0x6   :  { %117 = vperm.xlu0 %202, %v109_v2  }
  0x7d   :  { %v113_v8 = vpop.permute.xlu0 %112 }
  0x7e   :  { %v120_v9 = vmul.f32 %v113_v8, %v106_v5 }
  0x80   :  { %v122_v11 = vmul.f32 %v120_v9, %v106_v5 }
  0x81   :  { %v118_v12 = vpop.permute.xlu0 %117 }
  0x82   :  { %v121_v13 = vmul.f32 %v118_v12, %v107_v10  ;;  %v124_v14 = vadd.f32 1e-05, %v122_v11 }
  0x84   :  { %v123_v15 = vmul.f32 %v121_v13, %v107_v10  ;;  %126 = vst [vmem:[%s259_s3] sm:$0xff] %v124_v14 }
  0x86   :  { %v125_v16 = vadd.f32 1e-05, %v123_v15  ;;  %v139_v17 = vadd.f32 %v123_v15, %v122_v11 }
  0x88   :  { %127 = vst [vmem:[%s259_s3 + $0x8] sm:$0xff] %v125_v16  ;;  %140 = vadd.xlane.f32.xlu1 %v139_v17 }
 0x111   :  { %v141_v18 = vpop.xlane.xlu1 %140 }
 0x112   :  { %v142_v19 = vrot.slane %v141_v18, 4 }
 0x114   :  { %v143_v20 = vadd.f32 %v142_v19, %v141_v18 }
 0x116   :  { %v144_v21 = vrot.slane %v143_v20, 2 }
 0x118   :  { %v145_v22 = vadd.f32 %v144_v21, %v143_v20 }
 0x11a   :  { %v146_v23 = vrot.slane %v145_v22, 1 }
 0x11c   :  { %v147_v24 = vadd.f32 %v146_v23, %v145_v22 }
 0x11e   :  { %199 = vpush %v147_v24 }
 0x14f   :  { %s200_s1 = spop %199 }
 0x150   :  { %v149_v25 = vstv %s200_s1 }
 0x151   :  { %150 = vst [vmem:[%s260_s4] sm:$0xff] %v149_v25 }

</bundles_post_ra>
